<compile_context>
chip_gen: v5e
topology: v5e:2x2
jax: 0.10.0
libtpu: 0.0.40
codegen_flags: <defaults>
</compile_context>

<pallas_src>
import jax
import jax.numpy as jnp
from jax.experimental import pallas as pl
from jax.experimental.pallas import tpu as pltpu

_MIB = 1024 * 1024
_BUFS = 6          # 2x in + 2x out double-buffers + ~2 blocks of in-kernel temps
_SLACK = 4 * _MIB  # weights-adjacent headroom


# -----------------------------------------------------------------------------
# Kernels
# -----------------------------------------------------------------------------
def se_kernel(x_ref, w1_ref, w2_ref, o_ref):
    """Fused squeeze->excite->scale for one batch tile.

    x_ref / o_ref: (TB, C, HW)   (NCHW with H*W collapsed onto the lane axis)
    w1_ref: (C, Cr)   w2_ref: (Cr, C)
    """
    # Squeeze: spatial mean over the lane axis, f32 accumulation, no f32 copy
    # of the whole block.
    y = jnp.mean(x_ref[...], axis=-1, dtype=jnp.float32)                # (TB, C)

    # Excitation: FC -> ReLU -> FC -> Sigmoid (tiny, f32 on the MXU).
    h = jnp.dot(y, w1_ref[...].astype(jnp.float32),
                preferred_element_type=jnp.float32)                     # (TB, Cr)
    h = jnp.maximum(h, 0.0)
    z = jnp.dot(h, w2_ref[...].astype(jnp.float32),
                preferred_element_type=jnp.float32)                     # (TB, C)
    s = 1.0 / (1.0 + jnp.exp(-z))                                       # sigmoid

    # Scale: broadcast s across the spatial (lane) axis; multiply in I/O dtype,
    # streaming straight from the input ref into the output ref.
    o_ref[...] = x_ref[...] * s[:, :, None].astype(o_ref.dtype)


def se_scale_kernel(x_ref, s_ref, o_ref):
    """Fallback scale-only kernel: (1, C, THW) * (1, C, 1)."""
    o_ref[...] = x_ref[...] * s_ref[...].astype(o_ref.dtype)


# -----------------------------------------------------------------------------
# Generation-aware tiling
# -----------------------------------------------------------------------------
def _vmem_capacity_bytes():
    try:
        return int(pltpu.get_tpu_info().vmem_capacity_bytes)
    except Exception:
        return 64 * _MIB          # conservative fallback: assume the small (v7x) VMEM


def _gen_params():
    vmem = _vmem_capacity_bytes()
    big_vmem = vmem >= 96 * _MIB  # v5e / v6e: 128 MiB VMEM, single TensorCore
    return dict(
        limit_cap=(100 * _MIB) if big_vmem else (48 * _MIB),
        min_block=4 * _MIB,       # never shrink blocks below this for grid shaping
        two_tc=not big_vmem,      # v7x heuristic: 64 MiB VMEM <=> 2 TensorCores
    )


# -----------------------------------------------------------------------------
# Wrapper
# -----------------------------------------------------------------------------
def _se_layer_impl(x, w1, w2):
    """x: (B, C, H, W); w1: (C, C//r); w2: (C//r, C) (PyTorch weights, transposed)."""
    B, C, H, W = x.shape
    HW = H * W
    Cr = w1.shape[1]
    itemsize = x.dtype.itemsize
    w_bytes = (C * Cr + Cr * C) * w1.dtype.itemsize

    p = _gen_params()
    per_batch = C * HW * itemsize                 # bytes of one batch element's block
    budget = p["limit_cap"] - 2 * w_bytes - _SLACK

    x3 = x.reshape(B, C, HW)                      # trailing-dim collapse: free bitcast

    if _BUFS * per_batch <= budget:
        # ---------------- main path: fused kernel, batch-tiled grid ----------------
        tb = max(1, min(B, budget // (_BUFS * per_batch)))

        if p["two_tc"] and B > 1 and pl.cdiv(B, tb) % 2 == 1:
            # Prefer an even grid so both v7x TensorCores stay busy, but never
            # shrink blocks below ~4 MiB to get one.
            min_tb = max(1, p["min_block"] // per_batch)
            for cand in range(min(tb, B), 0, -1):
                if cand < min_tb:
                    break
                if pl.cdiv(B, cand) % 2 == 0:
                    tb = cand
                    break

        block_bytes = tb * per_batch
        vmem_limit = int(min(p["limit_cap"],
                             max(32 * _MIB,
                                 _BUFS * block_bytes + 2 * w_bytes + _SLACK)))

        out3 = pl.pallas_call(
            se_kernel,
            out_shape=jax.ShapeDtypeStruct((B, C, HW), x.dtype),
            grid_spec=pltpu.PrefetchScalarGridSpec(
                num_scalar_prefetch=0,
                grid=(pl.cdiv(B, tb),),            # partial last block is fine
                in_specs=[
                    pl.BlockSpec((tb, C, HW), lambda b: (b, 0, 0)),
                    pl.BlockSpec((C, Cr), lambda b: (0, 0)),   # weights stay resident
                    pl.BlockSpec((Cr, C), lambda b: (0, 0)),
                ],
                out_specs=pl.BlockSpec((tb, C, HW), lambda b: (b, 0, 0)),
            ),
            compiler_params=pltpu.CompilerParams(
                dimension_semantics=("parallel",),
                vmem_limit_bytes=vmem_limit,
            ),
        )(x3, w1, w2)
    else:
        # ------------- fallback: one batch element alone blows the budget ----------
        # Pool + tiny excitation in plain XLA (single streaming pass over x), then a
        # spatially tiled Pallas scale pass.  Total HBM traffic: 2 reads + 1 write.
        y = jnp.mean(x3, axis=-1, dtype=jnp.float32)                      # (B, C)
        hmid = jnp.maximum(jnp.dot(y, w1.astype(jnp.float32)), 0.0)
        s = 1.0 / (1.0 + jnp.exp(-jnp.dot(hmid, w2.astype(jnp.float32))))
        s3 = s.reshape(B, C, 1)

        thw_raw = max(1, (p["limit_cap"] - _SLACK) // (5 * C * itemsize))
        thw = max(128, (thw_raw // 128) * 128)
        thw = min(thw, HW)
        block_bytes = C * thw * itemsize
        vmem_limit = int(min(p["limit_cap"],
                             max(32 * _MIB, 5 * block_bytes + _SLACK)))

        out3 = pl.pallas_call(
            se_scale_kernel,
            out_shape=jax.ShapeDtypeStruct((B, C, HW), x.dtype),
            grid_spec=pltpu.PrefetchScalarGridSpec(
                num_scalar_prefetch=0,
                grid=(B, pl.cdiv(HW, thw)),
                in_specs=[
                    pl.BlockSpec((1, C, thw), lambda b, h: (b, 0, h)),
                    pl.BlockSpec((1, C, 1), lambda b, h: (b, 0, 0)),
                ],
                out_specs=pl.BlockSpec((1, C, thw), lambda b, h: (b, 0, h)),
            ),
            compiler_params=pltpu.CompilerParams(
                dimension_semantics=("parallel", "parallel"),
                vmem_limit_bytes=vmem_limit,
            ),
        )(x3, s3)

    return out3.reshape(B, C, H, W)


se_layer = jax.jit(_se_layer_impl)


def se_layer_ref(x, w1, w2):
    """Pure-JAX reference mirroring the PyTorch module."""
    y = jnp.mean(x, axis=(2, 3))                 # (B, C)
    y = jnp.maximum(y @ w1, 0.0)                 # (B, C//r)
    y = jax.nn.sigmoid(y @ w2)                   # (B, C)
    return x * y[:, :, None, None]


if __name__ == "__main__":
    # in_dim=16, reduction_factor=8 -> hidden=2
    B, C, H, W = 2, 16, 16, 16
    Cr = C // 8

    key = jax.random.PRNGKey(0)
    kx, k1, k2 = jax.random.split(key, 3)
    x = jax.random.normal(kx, (B, C, H, W), dtype=jnp.float32)
    # PyTorch Linear(in, out).weight is (out, in); store transposed (in, out)
    # so the kernel computes y @ W directly.
    w1 = jax.random.normal(k1, (C, Cr), dtype=jnp.float32) * 0.1
    w2 = jax.random.normal(k2, (Cr, C), dtype=jnp.float32) * 0.1

    out = jax.block_until_ready(se_layer(x, w1, w2))
    ref = se_layer_ref(x, w1, w2)

    assert out.shape == (B, C, H, W)
    assert jnp.allclose(out, ref, atol=1e-5, rtol=1e-5), (
        f"max abs err {jnp.max(jnp.abs(out - ref))}")
    print("KERNEL_OK")
</pallas_src>

<mosaic_0001>
module attributes {stable_mosaic.version = 11 : i64} {
  func.func @se_kernel(%arg0: i32, %arg1: memref<2x16x256xf32, #tpu.memory_space<vmem>>, %arg2: memref<16x2xf32, #tpu.memory_space<vmem>>, %arg3: memref<2x16xf32, #tpu.memory_space<vmem>>, %arg4: memref<2x16x256xf32, #tpu.memory_space<vmem>>) attributes {dimension_semantics = [#tpu.dimension_semantics<parallel>], iteration_bounds = array<i64: 1>, scalar_prefetch = 0 : i64, scratch_operands = 0 : i64, tpu.core_type = #tpu.core_type<tc>, window_params = [{transform_indices = @transform_0, window_bounds = array<i64: 2, 16, 256>}, {pipeline_mode = #tpu.pipeline_mode<synchronous>, transform_indices = @transform_1, window_bounds = array<i64: 16, 2>}, {pipeline_mode = #tpu.pipeline_mode<synchronous>, transform_indices = @transform_2, window_bounds = array<i64: 2, 16>}, {transform_indices = @transform_3, window_bounds = array<i64: 2, 16, 256>}]} {
    %c0 = arith.constant 0 : index
    %c0_0 = arith.constant 0 : index
    %c0_1 = arith.constant 0 : index
    %0 = vector.load %arg1[%c0, %c0_0, %c0_1] : memref<2x16x256xf32, #tpu.memory_space<vmem>>, vector<2x16x256xf32>
    %cst = arith.constant dense<0.000000e+00> : vector<2x16xf32>
    %1 = vector.multi_reduction <add>, %0, %cst [2] : vector<2x16x256xf32> to vector<2x16xf32>
    %cst_2 = arith.constant 2.560000e+02 : f32
    %2 = vector.broadcast %cst_2 : f32 to vector<2x16xf32>
    %3 = arith.divf %1, %2 : vector<2x16xf32>
    %c0_3 = arith.constant 0 : index
    %c0_4 = arith.constant 0 : index
    %4 = vector.load %arg2[%c0_3, %c0_4] : memref<16x2xf32, #tpu.memory_space<vmem>>, vector<16x2xf32>
    %cst_5 = arith.constant dense<0.000000e+00> : vector<2x2xf32>
    %5 = tpu.matmul %3, %4, %cst_5 {dimension_numbers = #tpu.dot_dimension_numbers<[1], [0], [0], [1], [0, 0, 1, 1], [], []>} : vector<2x16xf32>, vector<16x2xf32>, vector<2x2xf32> -> vector<2x2xf32>
    %cst_6 = arith.constant 0.000000e+00 : f32
    %6 = vector.broadcast %cst_6 : f32 to vector<2x2xf32>
    %7 = arith.maximumf %5, %6 : vector<2x2xf32>
    %c0_7 = arith.constant 0 : index
    %c0_8 = arith.constant 0 : index
    %8 = vector.load %arg3[%c0_7, %c0_8] : memref<2x16xf32, #tpu.memory_space<vmem>>, vector<2x16xf32>
    %cst_9 = arith.constant dense<0.000000e+00> : vector<2x16xf32>
    %9 = tpu.matmul %7, %8, %cst_9 {dimension_numbers = #tpu.dot_dimension_numbers<[1], [0], [0], [1], [0, 0, 1, 1], [], []>} : vector<2x2xf32>, vector<2x16xf32>, vector<2x16xf32> -> vector<2x16xf32>
    %cst_10 = arith.constant 0.000000e+00 : f32
    %10 = vector.broadcast %cst_10 : f32 to vector<2x16xf32>
    %11 = arith.subf %10, %9 : vector<2x16xf32>
    %12 = math.exp %11 : vector<2x16xf32>
    %cst_11 = arith.constant 1.000000e+00 : f32
    %13 = vector.broadcast %cst_11 : f32 to vector<2x16xf32>
    %14 = arith.addf %13, %12 : vector<2x16xf32>
    %cst_12 = arith.constant 1.000000e+00 : f32
    %15 = vector.broadcast %cst_12 : f32 to vector<2x16xf32>
    %16 = arith.divf %15, %14 : vector<2x16xf32>
    %c0_13 = arith.constant 0 : index
    %c0_14 = arith.constant 0 : index
    %c0_15 = arith.constant 0 : index
    %17 = vector.load %arg1[%c0_13, %c0_14, %c0_15] : memref<2x16x256xf32, #tpu.memory_space<vmem>>, vector<2x16x256xf32>
    %18 = vector.shape_cast %16 : vector<2x16xf32> to vector<2x16x1xf32>
    %19 = vector.broadcast %18 : vector<2x16x1xf32> to vector<2x16x256xf32>
    %20 = arith.mulf %17, %19 : vector<2x16x256xf32>
    %c0_16 = arith.constant 0 : index
    %c0_17 = arith.constant 0 : index
    %c0_18 = arith.constant 0 : index
    %21 = vector.load %arg4[%c0_16, %c0_17, %c0_18] : memref<2x16x256xf32, #tpu.memory_space<vmem>>, vector<2x16x256xf32>
    tpu.vector_store %arg4[%c0_16, %c0_17, %c0_18], %20 {strides = array<i32>} : memref<2x16x256xf32, #tpu.memory_space<vmem>>, vector<2x16x256xf32>,
    return
  }
  func.func @transform_0(%arg0: i32) -> (i32, i32, i32) {
    %c0_i32 = arith.constant 0 : i32
    %c0_i32_0 = arith.constant 0 : i32
    %c0_i32_1 = arith.constant 0 : i32
    return %arg0, %c0_i32, %c0_i32_0 : i32, i32, i32
  }
  func.func @transform_1(%arg0: i32) -> (i32, i32) {
    %c0_i32 = arith.constant 0 : i32
    %c0_i32_0 = arith.constant 0 : i32
    %c0_i32_1 = arith.constant 0 : i32
    return %c0_i32, %c0_i32_0 : i32, i32
  }
  func.func @transform_2(%arg0: i32) -> (i32, i32) {
    %c0_i32 = arith.constant 0 : i32
    %c0_i32_0 = arith.constant 0 : i32
    %c0_i32_1 = arith.constant 0 : i32
    return %c0_i32, %c0_i32_0 : i32, i32
  }
  func.func @transform_3(%arg0: i32) -> (i32, i32, i32) {
    %c0_i32 = arith.constant 0 : i32
    %c0_i32_0 = arith.constant 0 : i32
    %c0_i32_1 = arith.constant 0 : i32
    return %arg0, %c0_i32, %c0_i32_0 : i32, i32, i32
  }
}

</mosaic_0001>

<bundles_post_ra>
// kernel: _se_layer_impl.1
= control target key start
LH: loop header
LB: loop body
LE: loop exit
PB: predicated region body
PF: predicated region fallthrough
CT: control target
= control target key end

     0   :  { %v196_v12 = vmov 256.0   ;;  %v51_v21 = vlaneseq  ;;  %vm56_vm1 = vcmask 130112   ;;  %vm61_vm2 = vcmask 1041409   ;;  %s306_s0 = inlined_call_operand.vmem [shape: f32[2,16,256], index: 0, kind: input, shape index: {}]   ;;  %s307_s1 = inlined_call_operand.vmem [shape: f32[16,2], index: 1, kind: input, shape index: {}]   ;;  %s308_s2 = inlined_call_operand.vmem [shape: f32[2,16], index: 2, kind: input, shape index: {}]   ;;  %s309_s3 = inlined_call_operand.vmem [shape: f32[2,16,256], index: 3, kind: output, shape index: {}]  }
   0x1   :  { %v220_v0 = vld [vmem:[%s306_s0 + $0x20] sm:$0xff]  ;;  %v225_v1 = vld [vmem:[%s306_s0 + $0x28] sm:$0xff]  ;;  %v244_v6 = vld [vmem:[%s306_s0 + $0x30] sm:$0xff]  ;;  %190 = vrcp.f32 %v196_v12  ;;  %vm63_vm3 = vcmask 130048   ;;  %vm92_vm4 = vcmask 1041408   ;;  %vm88_vm5 = vcmask 15360  }
   0x2   :  { %v230_v2 = vld [vmem:[%s306_s0] sm:$0xff]  ;;  %v28_v3 = vadd.f32 %v225_v1, %v220_v0  ;;  %v237_v4 = vld [vmem:[%s306_s0 + $0x8] sm:$0xff]  ;;  %v249_v7 = vld [vmem:[%s306_s0 + $0x38] sm:$0xff]  ;;  %v52_v24 = vand.u32 127, %v51_v21  ;;  %v137_v42 = vshrl.u32 %v51_v21, 7 }
   0x3   :  { %v22_v5 = vadd.f32 %v237_v4, %v230_v2  ;;  %v254_v8 = vld [vmem:[%s306_s0 + $0x10] sm:$0xff]  ;;  %v259_v9 = vld [vmem:[%s306_s0 + $0x18] sm:$0xff]  ;;  %v31_v10 = vadd.f32 %v249_v7, %v244_v6  ;;  %v46_v13 = vld [vmem:[%s307_s1 + $0x8] sm:$0xff] }
   0x4   :  { %29 = vadd.xlane.f32.xlu1 %v28_v3  ;;  %v25_v11 = vadd.f32 %v259_v9, %v254_v8  ;;  %v45_v14 = vld [vmem:[%s307_s1] sm:$0xff]  ;;  %80 = vmatpush.msra.mxu0 %v46_v13  ;;  %v54_v26 = vadd.s32 4294967288, %v52_v24  ;;  %v144_v43 = vadd.s32 8, %v137_v42 }
   0x5   :  { %23 = vadd.xlane.f32.xlu0 %v22_v5  ;;  %v87_v39 = vld [vmem:[%s308_s2] sm:$0x3]  ;;  %185 = vset.pattern.permute.xlu2 %v137_v42 }
   0x6   :  { %81 = vmatpush.msra.mxu0 %v45_v14  ;;  %182 = vmatpush.msk.msra.mxu1 %vm92_vm4, %v87_v39 }
   0x7   :  { %v191_v15 = vpop.eup %190  ;;  %187 = vset.pattern.permute.xlu0 %v137_v42  ;;  %188 = vset.pattern.permute.xlu1 %v144_v43 }
   0x8   :  { %v35_v16 = vmul.f32 256.0, %v191_v15  ;;  %vm39_vm0 = vweird.f32 %v191_v15 }
   0xa   :  { %v36_v17 = vsub.f32 1.0, %v35_v16 }
   0xc   :  { %32 = vadd.xlane.f32.xlu1 %v31_v10  ;;  %v37_v18 = vmul.f32 %v191_v15, %v36_v17 }
   0xd   :  { %26 = vadd.xlane.f32.xlu0 %v25_v11 }
   0xe   :  { %v38_v19 = vadd.f32 %v191_v15, %v37_v18 }
  0x10   :  { %v40_v23 = vsel %vm39_vm0, %v191_v15, %v38_v19 }
  0x77   :  { %v30_v20 = vpop.xlane.xlu1 %29 }
  0x78   :  { %v24_v22 = vpop.xlane.xlu0 %23  ;;  %v43_v25 = vmul.f32 %v40_v23, %v30_v20 }
  0x79   :  { %v41_v27 = vmul.f32 %v40_v23, %v24_v22 }
  0x7a   :  { %v58_v32 = vperm.slane %v43_v25, %v52_v24 }
  0x7b   :  { %v53_v34 = vperm.slane %v41_v27, %v52_v24 }
  0x7f   :  { %v33_v28 = vpop.xlane.xlu1 %32 }
  0x80   :  { %v44_v29 = vmul.f32 %v40_v23, %v33_v28  ;;  %v27_v30 = vpop.xlane.xlu0 %26 }
  0x81   :  { %v42_v31 = vmul.f32 %v40_v23, %v27_v30 }
  0x82   :  { %v59_v33 = vperm.slane %v44_v29, %v54_v26 }
  0x83   :  { %v55_v35 = vperm.slane %v42_v31, %v54_v26 }
  0x84   :  { %v60_v36 = vsel %vm56_vm1, %v59_v33, %v58_v32 }
  0x85   :  { %v57_v37 = vsel %vm56_vm1, %v55_v35, %v53_v34 }
  0x86   :  { %v62_v38 = vsel %vm61_vm2, %v60_v36, %v57_v37 }
  0x87   :  { %181 = vmatmul.msk.f32.vlgmr.msra.gmra.mxu0 %vm63_vm3, %v62_v38 }
 0x104   :  { %v83_v40 = vpop.f32.mrf.mxu0 }
 0x105   :  { %v86_v41 = vmax.f32 %v83_v40, 0.0 }
 0x107   :  { %183 = vmatmul.msk.f32.vlgmr.msra.gmra.mxu1 %vm88_vm5, %v86_v41 }
 0x184   :  { %v113_v44 = vpop.f32.mrf.mxu1 }
 0x185   :  { %v116_v45 = vsub.f32 0.0, %v113_v44 }
 0x187   :  { %v117_v46 = vmul.f32 1.442695, %v116_v45 }
 0x189   :  { %192 = vpow2.f32 %v117_v46 }
 0x18f   :  { %v193_v47 = vpop.eup %192 }
 0x190   :  { %v119_v48 = vadd.f32 1.0, %v193_v47 }
 0x192   :  { %194 = vrcp.f32 %v119_v48  ;;  %v131_v52 = vand.u32 2147483648, %v119_v48  ;;  %v129_v54 = vand.u32 2147483647, %v119_v48  ;;  %vm125_vm7 = vweird.f32 %v119_v48 }
 0x194   :  { %v132_v56 = vor.u32 1.1754944e-38, %v131_v52  ;;  %vm130_vm9 = vcmp.eq.f32.partialorder %v129_v54, 8.507059e+37 }
 0x198   :  { %v195_v49 = vpop.eup %194 }
 0x199   :  { %v121_v50 = vmul.f32 %v195_v49, %v119_v48  ;;  %vm126_vm6 = vweird.f32 %v195_v49 }
 0x19a   :  { %vm127_vm8 = vmor %vm125_vm7, %vm126_vm6 }
 0x19b   :  { %v122_v51 = vsub.f32 1.0, %v121_v50 }
 0x19d   :  { %v123_v53 = vmul.f32 %v195_v49, %v122_v51 }
 0x19f   :  { %v124_v55 = vadd.f32 %v195_v49, %v123_v53 }
 0x1a1   :  { %v128_v57 = vsel %vm127_vm8, %v195_v49, %v124_v55 }
 0x1a2   :  { %v133_v58 = vsel %vm130_vm9, %v132_v56, %v128_v57 }
 0x1a3   :  { %v148_v59 = vperm.slane %v133_v58, 1  ;;  %v135_v60 = vperm.slane %v133_v58, 0 }
 0x1a5   :  { %159 = vperm.xlu1 %188, %v148_v59   ;;  %153 = vperm.xlu0 %187, %v148_v59  }
 0x1a6   :  { %140 = vperm.xlu2 %185, %v135_v60  }
 0x1ad   :  { %189 = vset.pattern.permute.xlu0 %v144_v43 }
 0x1ae   :  { %186 = vset.pattern.permute.xlu2 %v144_v43 }
 0x1b6   :  { %146 = vperm.xlu2 %186, %v135_v60  }
 0x200   :  { %v141_v61 = vpop.permute.xlu2 %140 }
 0x201   :  { %v161_v62 = vmul.f32 %v141_v61, %v230_v2  ;;  %v162_v63 = vmul.f32 %v141_v61, %v237_v4 }
 0x203   :  { %169 = vst [vmem:[%s309_s3] sm:$0xff] %v161_v62 }
 0x204   :  { %170 = vst [vmem:[%s309_s3 + $0x8] sm:$0xff] %v162_v63 }
 0x210   :  { %v147_v3 = vpop.permute.xlu2 %146 }
 0x211   :  { %v163_v5 = vmul.f32 %v147_v3, %v254_v8  ;;  %v164_v10 = vmul.f32 %v147_v3, %v259_v9 }
 0x213   :  { %171 = vst [vmem:[%s309_s3 + $0x10] sm:$0xff] %v163_v5 }
 0x214   :  { %172 = vst [vmem:[%s309_s3 + $0x18] sm:$0xff] %v164_v10 }
 0x217   :  { %v160_v2 = vpop.permute.xlu1 %159  ;;  %v154_v4 = vpop.permute.xlu0 %153 }
 0x218   :  { %v167_v11 = vmul.f32 %v160_v2, %v244_v6  ;;  %v168_v12 = vmul.f32 %v160_v2, %v249_v7  ;;  %v165_v13 = vmul.f32 %v154_v4, %v220_v0  ;;  %v166_v8 = vmul.f32 %v154_v4, %v225_v1 }
 0x21a   :  { %175 = vst [vmem:[%s309_s3 + $0x30] sm:$0xff] %v167_v11 }
 0x21b   :  { %176 = vst [vmem:[%s309_s3 + $0x38] sm:$0xff] %v168_v12 }
 0x21c   :  { %173 = vst [vmem:[%s309_s3 + $0x20] sm:$0xff] %v165_v13 }
 0x21d   :  { %174 = vst [vmem:[%s309_s3 + $0x28] sm:$0xff] %v166_v8 }

</bundles_post_ra>
